<compile_context>
chip_gen: v7x
topology: tpu7x:2x2x1
jax: 0.10.0
libtpu: 0.0.40
codegen_flags: <defaults>
</compile_context>

<pallas_src>
import jax
import jax.numpy as jnp
from jax.experimental import pallas as pl
from jax.experimental.pallas import tpu as pltpu

# --- configuration consistent with the module --------------------------------
BATCH = 2
HIDDEN = 32              # hidden_dim
HALF = HIDDEN // 2       # half_dim
HM_W, HM_L = 8, 8        # heightmap_width, heightmap_length
HM_CH = 2                # HeightmapEncoder input channels
HM_FLAT = HM_CH * HM_W * HM_L   # 128
GATES = 3 * HIDDEN       # GRU gate width (r, z, n) = 96
LANES = 128              # packed weight buffer lane width (full vreg)

# MXU operand dtype.  bf16 halves weight-DMA bytes and avoids multi-pass f32
# matmuls on v5e/v6e/v7x; accumulation and all gate math stay f32.
MXU_DTYPE = jnp.bfloat16

# Stage-1 contraction (K) layout, shared by the activation row x1 and the
# packed-weight rows (block-diagonal RHS):
C_HM  = 0                  # cols   0:128  flattened heightmap
C_H0  = HM_FLAT            # cols 128:160  previous hidden state h0 (lane-aligned)
C_PRE = C_H0 + HIDDEN      # cols 160:163  pre_box
C_ONE = C_PRE + 3          # col  163      constant 1.0  (drives the bias row)
R_BIH = C_ONE + 1          # row  164      holds b_ih[n] (x1 col 164 is 0 -> inert in stage 1)
K1    = 176                # stage-1 K, padded to a multiple of 16 (bf16 sublane tile)
R_IH  = K1                 # rows 176:208  W_ih  [32, 96]  (stage-2 RHS)
R_TOTAL = R_IH + HIDDEN    # 208 rows x 128 lanes

# Stage-1 output lane layout:
L_PRE = 0                  # lanes  0:16   pre_vec
L_HM  = HALF               # lanes 16:32   height_vec
L_GH  = HIDDEN             # lanes 32:128  gh = h0 @ W_hh + b_hh (+ b_ih[r,z] folded)


# --------------------------------- kernel ------------------------------------
def pack_decoder_kernel(x_ref, w_ref, out_ref):
    f32 = jnp.float32
    H, H2 = HIDDEN, 2 * HIDDEN

    x1 = x_ref[...]                                      # [B, 176]  (MXU dtype)
    w1 = w_ref[0:K1, :]                                  # [176, 128]

    # Stage 1: one block-diagonal matmul -> [pre_vec | hm_vec | gh'] (biases folded
    # in via the constant-1 activation column hitting the bias row).
    y1 = jnp.dot(x1, w1, preferred_element_type=f32)     # [B, 128]

    dec = y1[:, :H]                                      # decoder_vec = cat(pre_vec, hm_vec)
    gh = y1[:, L_GH:]                                    # [B, 96] = h0@W_hh + b_hh (+ b_ih[r,z])

    # Stage 2: gi = decoder_vec @ W_ih  (lanes 96:128 of the RHS are zero padding).
    w2 = w_ref[R_IH:R_IH + H, :]                         # [32, 128]
    gi = jnp.dot(dec.astype(MXU_DTYPE), w2, preferred_element_type=f32)   # [B, 128]

    # GRU cell (PyTorch gate order r, z, n); all elementwise math in f32.
    rz = jax.nn.sigmoid(gi[:, :H2] + gh[:, :H2])         # one fused sigmoid for r|z
    r, z = rz[:, :H], rz[:, H:H2]
    b_ih_n = w_ref[R_BIH:R_BIH + 1, :H].astype(f32)      # [1, 32]  (only un-foldable bias)
    n = jnp.tanh(gi[:, H2:GATES] + b_ih_n + r * gh[:, H2:])
    h0 = x_ref[:, C_H0:C_H0 + H].astype(f32)             # [B, 32], lane-aligned slice of x1

    out_ref[...] = (1.0 - z) * n + z * h0                # new hidden state


# -------------------------------- wrapper ------------------------------------
_VMEM = pl.BlockSpec(memory_space=pltpu.MemorySpace.VMEM)   # whole array resident in VMEM


def pack_decoder_forward(pre_box, heightmap, last_hh, w_pack):
    """pre_box: [B, 3]; heightmap: [B, 2, W, L]; last_hh: [1, B, H] or None."""
    B = pre_box.shape[0]
    hm_flat = heightmap.reshape(B, HM_FLAT).astype(jnp.float32)
    if last_hh is None:
        h0 = jnp.zeros((B, HIDDEN), jnp.float32)
    else:
        h0 = last_hh.reshape(B, HIDDEN).astype(jnp.float32)

    # Single packed activation buffer: [heightmap | h0 | pre_box | 1 | 0-pad].
    one = jnp.ones((B, 1), jnp.float32)
    pad = jnp.zeros((B, K1 - (C_ONE + 1)), jnp.float32)
    x1 = jnp.concatenate(
        [hm_flat, h0, pre_box.astype(jnp.float32), one, pad], axis=1
    ).astype(w_pack.dtype)                               # [B, 176]

    flops = 2 * B * K1 * LANES + 2 * B * HIDDEN * LANES + 16 * B * HIDDEN
    bytes_accessed = (w_pack.size * w_pack.dtype.itemsize
                      + x1.size * x1.dtype.itemsize
                      + B * HIDDEN * 4)

    h_new = pl.pallas_call(
        pack_decoder_kernel,
        out_shape=jax.ShapeDtypeStruct((B, HIDDEN), jnp.float32),
        in_specs=[_VMEM, _VMEM],
        out_specs=_VMEM,
        cost_estimate=pl.CostEstimate(
            flops=int(flops),
            transcendentals=3 * B * HIDDEN,
            bytes_accessed=int(bytes_accessed)),
    )(x1, w_pack)

    rnn_out = h_new                  # == rnn_out.squeeze(1)
    new_last_hh = h_new[None]        # [1, B, H]
    return rnn_out, new_last_hh


# ------------------------ one-time parameter packing --------------------------
def prepare_params(p, dtype=MXU_DTYPE):
    """Pack all weights AND biases into one [208, 128] block-diagonal buffer.

    Weights must already be [in, out] with PyTorch GRU gate order (r, z, n)
    preserved (transpose Conv1d [out,in,1] and GRU [3H,in] when importing a
    state_dict).
    """
    H = HIDDEN
    w = jnp.zeros((R_TOTAL, LANES), jnp.float32)
    # stage-1 block-diagonal weights
    w = w.at[C_HM:C_HM + HM_FLAT, L_HM:L_HM + HALF].set(p['w_hm'])
    w = w.at[C_H0:C_H0 + H, L_GH:].set(p['w_hh'])
    w = w.at[C_PRE:C_PRE + 3, L_PRE:L_PRE + HALF].set(p['w_pre'])
    # stage-1 bias row (multiplied by the constant-1 activation column)
    b_row = jnp.zeros((LANES,), jnp.float32)
    b_row = b_row.at[L_PRE:L_PRE + HALF].set(p['b_pre'])
    b_row = b_row.at[L_HM:L_HM + HALF].set(p['b_hm'])
    # fold b_ih[r], b_ih[z] into the gh bias (r/z gates use gi + gh symmetrically)
    b_gh = p['b_hh'].at[:2 * H].add(p['b_ih'][:2 * H])
    b_row = b_row.at[L_GH:].set(b_gh)
    w = w.at[C_ONE].set(b_row)
    # b_ih[n] cannot be folded (it must not be scaled by r); park it in a padding
    # row that the stage-1 matmul never touches (x1 col R_BIH is zero).
    w = w.at[R_BIH, :H].set(p['b_ih'][2 * H:])
    # stage-2 weights (lanes 96:128 stay zero -> harmless extra output lanes)
    w = w.at[R_IH:R_IH + H, :GATES].set(p['w_ih'])
    return w.astype(dtype)


# ------------------------ deterministic parameter init ------------------------
def init_params(key):
    ks = jax.random.split(key, 8)

    def xavier(k, shape):
        fan_in, fan_out = shape[0], shape[1]
        limit = (6.0 / (fan_in + fan_out)) ** 0.5
        return jax.random.uniform(k, shape, jnp.float32, -limit, limit)

    def small(k, shape):
        return 0.1 * jax.random.normal(k, shape, jnp.float32)

    return {
        'w_pre': xavier(ks[0], (3, HALF)),        'b_pre': small(ks[1], (HALF,)),
        'w_hm':  xavier(ks[2], (HM_FLAT, HALF)),  'b_hm':  small(ks[3], (HALF,)),
        'w_ih':  xavier(ks[4], (HIDDEN, GATES)),  'b_ih':  small(ks[6], (GATES,)),
        'w_hh':  xavier(ks[5], (HIDDEN, GATES)),  'b_hh':  small(ks[7], (GATES,)),
    }


# ------------------------- pure-JAX references --------------------------------
def reference_f32(pre_box, heightmap, last_hh, p):
    """Full-f32 reference of the module's math."""
    B, H = pre_box.shape[0], HIDDEN
    pre_vec = pre_box @ p['w_pre'] + p['b_pre']                     # Conv1d k=1
    # TODO(synk): HeightmapEncoder class is not provided in the source; modeled
    # here (and in the kernel) as flatten + single linear projection to half_dim.
    hm_vec = heightmap.reshape(B, -1) @ p['w_hm'] + p['b_hm']
    x = jnp.concatenate([pre_vec, hm_vec], axis=1)                  # decoder_vec
    h0 = jnp.zeros((B, H), jnp.float32) if last_hh is None else last_hh[0]
    gi = x @ p['w_ih'] + p['b_ih']
    gh = h0 @ p['w_hh'] + p['b_hh']
    r = jax.nn.sigmoid(gi[:, :H] + gh[:, :H])
    z = jax.nn.sigmoid(gi[:, H:2 * H] + gh[:, H:2 * H])
    n = jnp.tanh(gi[:, 2 * H:] + r * gh[:, 2 * H:])
    h_new = (1.0 - z) * n + z * h0
    return h_new, h_new[None]


def reference_matched(pre_box, heightmap, last_hh, p, dtype=MXU_DTYPE):
    """Reference at the SAME precision as the kernel's MXU path
    (operands cast to `dtype`, f32 accumulation, f32 gate math)."""
    B, H = pre_box.shape[0], HIDDEN
    c = lambda a: a.astype(dtype)
    f = lambda a: c(a).astype(jnp.float32)
    dot = lambda a, b: jnp.dot(c(a), c(b), preferred_element_type=jnp.float32)
    pre_vec = dot(pre_box, p['w_pre']) + f(p['b_pre'])
    hm_vec = dot(heightmap.reshape(B, -1), p['w_hm']) + f(p['b_hm'])
    x = jnp.concatenate([pre_vec, hm_vec], axis=1)
    h0 = jnp.zeros((B, H), jnp.float32) if last_hh is None else last_hh[0]
    gi = dot(x, p['w_ih']) + f(p['b_ih'])
    gh = dot(h0, p['w_hh']) + f(p['b_hh'])
    r = jax.nn.sigmoid(gi[:, :H] + gh[:, :H])
    z = jax.nn.sigmoid(gi[:, H:2 * H] + gh[:, H:2 * H])
    n = jnp.tanh(gi[:, 2 * H:] + r * gh[:, 2 * H:])
    h_new = (1.0 - z) * n + z * f(h0)
    return h_new, h_new[None]


# ----------------------------------- main -------------------------------------
if __name__ == "__main__":
    key = jax.random.PRNGKey(0)
    k_pre, k_hm, k_hh, k_param = jax.random.split(key, 4)

    pre_box = jax.random.normal(k_pre, (BATCH, 3), jnp.float32)
    heightmap = jax.random.normal(k_hm, (BATCH, HM_CH, HM_W, HM_L), jnp.float32)
    last_hh = jax.random.normal(k_hh, (1, BATCH, HIDDEN), jnp.float32)

    params = init_params(k_param)
    w_pack = prepare_params(params)           # host-side packing, done ONCE

    fwd = jax.jit(pack_decoder_forward)
    rnn_out, new_hh = fwd(pre_box, heightmap, last_hh, w_pack)
    rnn_out = jax.block_until_ready(rnn_out)
    new_hh = jax.block_until_ready(new_hh)

    assert rnn_out.shape == (BATCH, HIDDEN), rnn_out.shape
    assert new_hh.shape == (1, BATCH, HIDDEN), new_hh.shape

    # Tight check against a reference at the kernel's MXU precision.
    m_out, m_hh = reference_matched(pre_box, heightmap, last_hh, params)
    assert jnp.allclose(rnn_out, m_out, atol=1e-3, rtol=1e-3), (rnn_out, m_out)
    assert jnp.allclose(new_hh, m_hh, atol=1e-3, rtol=1e-3)

    # Sanity bound against the pure-f32 reference (difference only from the
    # documented bf16 weight/activation quantization of the MXU path).
    f_out, _ = reference_f32(pre_box, heightmap, last_hh, params)
    tol = 2e-2 if MXU_DTYPE == jnp.bfloat16 else 1e-4
    assert jnp.allclose(rnn_out, f_out, atol=tol, rtol=tol), (rnn_out, f_out)

    # Also exercise the last_hh=None path (h0 == 0, matching nn.GRU's default).
    out0, hh0 = fwd(pre_box, heightmap, None, w_pack)
    out0 = jax.block_until_ready(out0)
    m_out0, _ = reference_matched(pre_box, heightmap, None, params)
    assert jnp.allclose(out0, m_out0, atol=1e-3, rtol=1e-3)
    assert hh0.shape == (1, BATCH, HIDDEN)

    print("KERNEL_OK")
</pallas_src>

<mosaic_0001>
module attributes {stable_mosaic.version = 11 : i64} {
  func.func @pack_decoder_kernel(%arg0: memref<2x176xbf16, #tpu.memory_space<vmem>>, %arg1: memref<208x128xbf16, #tpu.memory_space<vmem>>, %arg2: memref<2x32xf32, #tpu.memory_space<vmem>>) attributes {dimension_semantics = [], scalar_prefetch = 0 : i64, scratch_operands = 0 : i64, tpu.core_type = #tpu.core_type<tc>} {
    %c0 = arith.constant 0 : index
    %c0_0 = arith.constant 0 : index
    %0 = vector.load %arg0[%c0, %c0_0] : memref<2x176xbf16, #tpu.memory_space<vmem>>, vector<2x176xbf16>
    %c0_1 = arith.constant 0 : index
    %c0_2 = arith.constant 0 : index
    %1 = vector.load %arg1[%c0_1, %c0_2] : memref<208x128xbf16, #tpu.memory_space<vmem>>, vector<176x128xbf16>
    %cst = arith.constant dense<0.000000e+00> : vector<2x128xf32>
    %2 = tpu.matmul %0, %1, %cst {dimension_numbers = #tpu.dot_dimension_numbers<[1], [0], [0], [1], [0, 0, 1, 1], [], []>} : vector<2x176xbf16>, vector<176x128xbf16>, vector<2x128xf32> -> vector<2x128xf32>
    %3 = vector.extract_strided_slice %2 {offsets = [0, 0], sizes = [2, 32], strides = [1, 1]} : vector<2x128xf32> to vector<2x32xf32>
    %4 = vector.extract_strided_slice %2 {offsets = [0, 32], sizes = [2, 96], strides = [1, 1]} : vector<2x128xf32> to vector<2x96xf32>
    %c176 = arith.constant 176 : index
    %c0_3 = arith.constant 0 : index
    %5 = vector.load %arg1[%c176, %c0_3] : memref<208x128xbf16, #tpu.memory_space<vmem>>, vector<32x128xbf16>
    %6 = arith.truncf %3 : vector<2x32xf32> to vector<2x32xbf16>
    %cst_4 = arith.constant dense<0.000000e+00> : vector<2x128xf32>
    %7 = tpu.matmul %6, %5, %cst_4 {dimension_numbers = #tpu.dot_dimension_numbers<[1], [0], [0], [1], [0, 0, 1, 1], [], []>} : vector<2x32xbf16>, vector<32x128xbf16>, vector<2x128xf32> -> vector<2x128xf32>
    %8 = vector.extract_strided_slice %7 {offsets = [0, 0], sizes = [2, 64], strides = [1, 1]} : vector<2x128xf32> to vector<2x64xf32>
    %9 = vector.extract_strided_slice %4 {offsets = [0, 0], sizes = [2, 64], strides = [1, 1]} : vector<2x96xf32> to vector<2x64xf32>
    %10 = arith.addf %8, %9 : vector<2x64xf32>
    %11 = arith.negf %10 : vector<2x64xf32>
    %12 = math.exp %11 : vector<2x64xf32>
    %cst_5 = arith.constant 1.000000e+00 : f32
    %13 = vector.broadcast %cst_5 : f32 to vector<2x64xf32>
    %14 = arith.addf %13, %12 : vector<2x64xf32>
    %15 = arith.divf %13, %14 : vector<2x64xf32>
    %16 = vector.extract_strided_slice %15 {offsets = [0, 0], sizes = [2, 32], strides = [1, 1]} : vector<2x64xf32> to vector<2x32xf32>
    %17 = vector.extract_strided_slice %15 {offsets = [0, 32], sizes = [2, 32], strides = [1, 1]} : vector<2x64xf32> to vector<2x32xf32>
    %c164 = arith.constant 164 : index
    %c0_6 = arith.constant 0 : index
    %18 = vector.load %arg1[%c164, %c0_6] : memref<208x128xbf16, #tpu.memory_space<vmem>>, vector<1x32xbf16>
    %19 = arith.extf %18 : vector<1x32xbf16> to vector<1x32xf32>
    %20 = vector.extract_strided_slice %7 {offsets = [0, 64], sizes = [2, 32], strides = [1, 1]} : vector<2x128xf32> to vector<2x32xf32>
    %21 = vector.broadcast %19 : vector<1x32xf32> to vector<2x32xf32>
    %22 = arith.addf %20, %21 : vector<2x32xf32>
    %23 = vector.extract_strided_slice %4 {offsets = [0, 64], sizes = [2, 32], strides = [1, 1]} : vector<2x96xf32> to vector<2x32xf32>
    %24 = arith.mulf %16, %23 : vector<2x32xf32>
    %25 = arith.addf %22, %24 : vector<2x32xf32>
    %26 = math.tanh %25 : vector<2x32xf32>
    %c0_7 = arith.constant 0 : index
    %c128 = arith.constant 128 : index
    %27 = vector.load %arg0[%c0_7, %c128] : memref<2x176xbf16, #tpu.memory_space<vmem>>, vector<2x32xbf16>
    %28 = arith.extf %27 : vector<2x32xbf16> to vector<2x32xf32>
    %cst_8 = arith.constant 1.000000e+00 : f32
    %29 = vector.broadcast %cst_8 : f32 to vector<2x32xf32>
    %30 = arith.subf %29, %17 : vector<2x32xf32>
    %31 = arith.mulf %30, %26 : vector<2x32xf32>
    %32 = arith.mulf %17, %28 : vector<2x32xf32>
    %33 = arith.addf %31, %32 : vector<2x32xf32>
    %c0_9 = arith.constant 0 : index
    %c0_10 = arith.constant 0 : index
    %34 = vector.load %arg2[%c0_9, %c0_10] : memref<2x32xf32, #tpu.memory_space<vmem>>, vector<2x32xf32>
    tpu.vector_store %arg2[%c0_9, %c0_10], %33 {strides = array<i32>} : memref<2x32xf32, #tpu.memory_space<vmem>>, vector<2x32xf32>,
    return
  }
}

</mosaic_0001>

<bundles_post_ra>
// kernel: pack_decoder_forward.1
= control target key start
LH: loop header
LB: loop body
LE: loop exit
PB: predicated region body
PF: predicated region fallthrough
CT: control target
= control target key end

     0   :  { %7 = vsyncpa [#allocation3], 0  ;;  %s389_s9 = smov [#allocation2]   ;;  %s447_s0 = inlined_call_operand.vmem [shape: bf16[2,176], index: 0, kind: input, shape index: {}]   ;;  %s448_s1 = inlined_call_operand.hbm [shape: bf16[208,128], index: 1, kind: input, shape index: {}]   ;;  %s449_s2 = inlined_call_operand.vmem [shape: f32[2,32], index: 2, kind: output, shape index: {}]  }
   0x1   :  { %s15_s10 = sshll.u32 %s389_s9, 4  ;;  %s365_s13 = scalar_lea.hbm %s448_s1, 1664  ;;  %s16_s10 = int_to_ptr.vmem [resolvable:$true] %s15_s10 }
   0x2   :  { %p366_p0 = scmp.ne.s32.totalorder %s448_s1, %s365_s13  ;;  %p369_p1 = scmp.lt.u32.totalorder %s365_s13, %s448_s1 }
   0x4   :  { %p371_p2 = pnand %p369_p1, %p366_p0 }
   0x6   :  { %374 = shalt.err (!%p371_p2)
}
   0x7   :  { %s375_s18 = scalar_lea.vmem %s16_s10, 1664  ;;  %p380_p4 = scmp.lt.s32.totalorder %s16_s10, %s16_s10 }
   0x8   :  { %p376_p3 = scmp.ne.s32.totalorder %s16_s10, %s375_s18  ;;  %p381_p5 = scmp.lt.s32.totalorder %s375_s18, %s375_s18 }
   0xa   :  { %p382_p6 = por %p381_p5, %p380_p4 }
   0xc   :  { %p383_p7 = pnand %p382_p6, %p376_p3 }
   0xe   :  { %386 = shalt.err (!%p383_p7)
}
   0xf   :  { %s390_s19 = smov 64   ;;  %s391_s20 = smov 4  }
  0x10   :  { %21 = dma.hbm_to_vmem [thread:$0]  %s448_s1, 1664, %s16_s10, [#allocation3], %s390_s19, %s390_s19, %s391_s20  }
  0x11   :  { %387 = dma.done.wait [#allocation3], 1664  }
  0x12   :  { %388 = vsyncadd [#allocation3], 4294965632  ;;  %v392_v0 = vmov 0   ;;  %v393_v1 = vmov 0.0   ;;  %v346_v2 = vld [vmem:[#allocation2] sm:$0xff]   ;;  %v347_v3 = vld [vmem:[#allocation2 + $0x8] sm:$0xff]   ;;  %v61_v6 = vlaneseq }
  0x13   :  { %143 = vmatprep.subr.bf16.mxu0 %v392_v0  ;;  %328 = vmatprep.subr.bf16.mxu1 %v393_v1  ;;  %v394_v4 = vmov 1966171168   ;;  %v348_v7 = vld [vmem:[#allocation2 + $0x10] sm:$0xff]   ;;  %v349_v10 = vld [vmem:[#allocation2 + $0x18] sm:$0xff]   ;;  %vm139_vm0 = vcmask 392192   ;;  %v350_v15 = vld [vmem:[#allocation2 + $0x20] sm:$0xff]  }
  0x14   :  { %144 = vmatpush1.bf16.msra.mxu0 %v346_v2  ;;  %v59_v5 = vunpack.c.l.s4 %v394_v4  ;;  %v428_v9 = vshrl.u32 %v61_v6, 7  ;;  %v308_v12 = vld.sshfl [vmem:[%s447_s0] sm:$0x11 pattern:$0x75316420]  ;;  %v357_v14 = vld [vmem:[#allocation2 + $0x58] sm:$0xff]  }
  0x15   :  { %145 = vmatprep.subr.bf16.mxu0 %v392_v0  ;;  %v57_v13 = vcombine.high %v308_v12, %v308_v12  ;;  %329 = vmatpush3.bf16.msra.mxu1 %v357_v14  ;;  %v351_v17 = vld [vmem:[#allocation2 + $0x28] sm:$0xff]   ;;  %v352_v18 = vld [vmem:[#allocation2 + $0x30] sm:$0xff]   ;;  %v353_v19 = vld [vmem:[#allocation2 + $0x38] sm:$0xff]   ;;  %vm395_vm1 = vmmov 0   ;;  %vm200_vm2 = vcmask 261120   ;;  %s396_s24 = smov 96  }
  0x16   :  { %v60_v8 = vunpack.c.0.s8 %v59_v5  ;;  %330 = vmatprep.subr.bf16.mxu1 %v393_v1  ;;  %v354_v20 = vld [vmem:[#allocation2 + $0x40] sm:$0xff]   ;;  %v355_v21 = vld [vmem:[#allocation2 + $0x48] sm:$0xff]   ;;  %v356_v22 = vld [vmem:[#allocation2 + $0x50] sm:$0xff]   ;;  %332 = vmatprep.mubr.msk.bf16.mxu1 %vm395_vm1, %v393_v1  ;;  %v259_v26 = vsub.s32 4, %v428_v9  ;;  %s397_s25 = smov 32   ;;  %vm301_vm3 = vcmask 254976  }
  0x17   :  { %v358_v24 = vld [vmem:[#allocation2 + $0x60] sm:$0xff]   ;;  %v255_v25 = vld [vmem:[#allocation2 + $0x50] sm:$0x4]  ;;  %v398_v43 = vmov 1983009808  }
  0x18   :  { %146 = vmatpush1.bf16.msra.mxu0 %v347_v3  ;;  %v63_v11 = vsub.s32 %v60_v8, %v428_v9  ;;  %v256_v27 = vunpack.c.l.bf16 %v255_v25  ;;  %v286_v44 = vunpack.c.l.s4 %v398_v43  ;;  %v276_v46 = vld [vmem:[%s447_s0 + $0x1] sm:$0x1] }
  0x19   :  { %147 = vmatprep.subr.bf16.mxu0 %v392_v0  ;;  %331 = vmatpush3.bf16.msra.mxu1 %v358_v24  ;;  %v277_v47 = vunpack.c.l.bf16 %v276_v46 }
  0x1a   :  { %v71_v16 = vrot.slane %v57_v13, %v63_v11  ;;  %v64_v23 = vrot.slane %v308_v12, %v63_v11  ;;  %v260_v28 = vrot.slane %v256_v27, %v259_v26  ;;  %v287_v45 = vunpack.c.0.s8 %v286_v44 }
  0x1c   :  { %148 = vmatpush1.bf16.msra.mxu0 %v348_v7  ;;  %320 = vmatprep.mubr.msk.bf16.mxu0 %vm139_vm0, %v71_v16  ;;  %v290_v48 = vsub.s32 %v287_v45, %v428_v9 }
  0x1d   :  { %149 = vmatprep.subr.bf16.mxu0 %v392_v0  ;;  %262 = vrot.lane.b32.xlu1 %v260_v28, %s390_s19 }
  0x1e   :  { %v291_v52 = vrot.slane %v277_v47, %v290_v48 }
  0x20   :  { %150 = vmatpush1.bf16.msra.mxu0 %v349_v10 }
  0x21   :  { %151 = vmatprep.subr.bf16.mxu0 %v392_v0 }
  0x24   :  { %152 = vmatpush1.bf16.msra.mxu0 %v350_v15 }
  0x25   :  { %153 = vmatprep.subr.bf16.mxu0 %v392_v0 }
  0x28   :  { %154 = vmatpush1.bf16.msra.mxu0 %v351_v17 }
  0x29   :  { %155 = vmatprep.subr.bf16.mxu0 %v392_v0 }
  0x2c   :  { %156 = vmatpush1.bf16.msra.mxu0 %v352_v18 }
  0x2d   :  { %157 = vmatprep.subr.bf16.mxu0 %v392_v0 }
  0x30   :  { %158 = vmatpush1.bf16.msra.mxu0 %v353_v19 }
  0x31   :  { %159 = vmatprep.subr.bf16.mxu0 %v392_v0 }
  0x34   :  { %160 = vmatpush1.bf16.msra.mxu0 %v354_v20 }
  0x35   :  { %161 = vmatprep.subr.bf16.mxu0 %v392_v0 }
  0x38   :  { %162 = vmatpush1.bf16.msra.mxu0 %v355_v21 }
  0x39   :  { %163 = vmatprep.subr.bf16.mxu0 %v392_v0 }
  0x3c   :  { %164 = vmatpush1.bf16.msra.mxu0 %v356_v22 }
  0x3f   :  { %176 = vmatmul.mubr.bf16.vlgmr.msra.gmra.mrb[0].mxu0 %v64_v23 }
  0x8f   :  { %v263_v53 = vpop.permute.xlu1 %262 }
 0x112   :  { %v177_v29 = vpop.f32.mrb[0].mxu0 }
 0x113   :  { %v187_v30 = vpack.c.bf16 %v177_v29, %v177_v29  ;;  %245 = vrot.lane.b32.xlu0 %v177_v29, %s396_s24  ;;  %v179_v31 = vpop.f32.mrb[1].mxu0 }
 0x114   :  { %v180_v32 = vpop.f32.mrb[2].mxu0 }
 0x115   :  { %v181_v33 = vpop.f32.mrb[3].mxu0  ;;  %333 = vmatmul.mubr.msk.bf16.vlgmr.msra.gmra.mrb[0].mxu1 %vm200_vm2, %v187_v30 }
 0x117   :  { %266 = vrot.lane.b32.xlu0 %v177_v29, %s397_s25 }
 0x185   :  { %v246_v34 = vpop.permute.xlu0 %245 }
 0x189   :  { %v267_v50 = vpop.permute.xlu0 %266 }
 0x1e8   :  { %v238_v35 = vpop.f32.mrb[0].mxu1 }
 0x1e9   :  { %v248_v36 = vadd.f32 %v246_v34, %v238_v35  ;;  %v334_v37 = vpop.f32.mrb[1].mxu1  ;;  %v265_v54 = vadd.f32 %v263_v53, %v238_v35 }
 0x1ea   :  { %v241_v38 = vpop.f32.mrb[2].mxu1 }
 0x1eb   :  { %v324_v39 = vmul.f32 -1.442695, %v248_v36  ;;  %v335_v40 = vpop.f32.mrb[3].mxu1 }
 0x1ed   :  { %359 = vpow2.f32 %v324_v39 }
 0x1f7   :  { %v360_v41 = vpop.eup %359 }
 0x1f8   :  { %v252_v42 = vadd.f32 1.0, %v360_v41 }
 0x1fa   :  { %361 = vrcp.f32 %v252_v42 }
 0x204   :  { %v362_v49 = vpop.eup %361 }
 0x205   :  { %v269_v51 = vmul.f32 %v362_v49, %v267_v50  ;;  %v278_v59 = vsub.f32 1.0, %v362_v49 }
 0x207   :  { %271 = vrot.lane.b32.xlu1 %v269_v51, %s390_s19 }
 0x20b   :  { %292 = vrot.lane.b32.xlu1 %v291_v52, %s397_s25 }
 0x279   :  { %v272_v55 = vpop.permute.xlu1 %271 }
 0x27a   :  { %v274_v56 = vadd.f32 %v272_v55, %v265_v54 }
 0x27c   :  { %363 = vtanh.f32 %v274_v56 }
 0x27d   :  { %v293_v58 = vpop.permute.xlu1 %292 }
 0x27e   :  { %v295_v61 = vmul.f32 %v362_v49, %v293_v58 }
 0x286   :  { %v364_v57 = vpop.eup %363 }
 0x287   :  { %280 = vrot.lane.b32.xlu0 %v364_v57, %s396_s24 }
 0x2f9   :  { %v281_v60 = vpop.permute.xlu0 %280 }
 0x2fa   :  { %v283_v62 = vmul.f32 %v281_v60, %v278_v59 }
 0x2fc   :  { %v296_v63 = vadd.f32 %v295_v61, %v283_v62 }
 0x2fe   :  { %298 = vrot.lane.b32.xlu0 %v296_v63, %s396_s24 }
 0x370   :  { %v299_v0 = vpop.permute.xlu0 %298 }
 0x371   :  { %302 = vst.msk [vmem:[%s449_s2] sm:$0x3] %vm301_vm3, %v299_v0 }
 0x372   :  { %307 = vsyncpa [#allocation3], 1 }

</bundles_post_ra>
